<compile_context>
chip_gen: v6e
topology: v6e:2x2x1
jax: 0.10.0
libtpu: 0.0.40
codegen_flags: <defaults>
</compile_context>

<pallas_src>
import functools
import math

import jax
import jax.numpy as jnp
import numpy as np
from jax import lax
from jax.experimental import pallas as pl
from jax.experimental.pallas import tpu as pltpu


def _round_up(a, b):
    return (a + b - 1) // b * b


# ----------------------------------------------------------------------------
# Kernel.  x block is (L*D, TN) lane-dense; weights are tiny and resident.
#   h0[s, n]   = sum_j W0[s, j] * x[0, j, n]                        (alpha folded into W0)
#   hk[s, n]   = sum_{j,r} W2_k[s, j*R+r] * x[k, j, n] * h[r, n]    k = 1 .. L-2   (MXU)
#   out[0, n]  = sum_j x[L-1, j, n] * (Wlast @ h)[j, n]             (omega folded into Wlast)
# ----------------------------------------------------------------------------
def _hankel_kernel(x_ref, w0_ref, w2_ref, wlast_ref, out_ref, *,
                   length, input_dim, rank, chunk):
    L, D, R = length, input_dim, rank
    TN = out_ref.shape[-1]
    n_chunks = TN // chunk

    # Weights are a few vregs at most; load once per grid step (resident across grid).
    w0 = w0_ref[...]                          # (R, D)
    wlast = wlast_ref[...]                    # (D, R)
    w2 = w2_ref[...] if L > 2 else None       # (L-2, R, D*R)

    def chunk_body(c, carry):
        off = pl.multiple_of(c * chunk, chunk)
        cols = pl.ds(off, chunk)

        # --- step 0: one (R, D) @ (D, C) matmul (alpha already folded in) ---
        x0 = x_ref[pl.ds(0, D), cols].astype(jnp.float32)              # (D, C)
        h = jnp.dot(w0, x0, preferred_element_type=jnp.float32)        # (R, C)

        # --- middle steps: build g on the VPU (multiplies only), contract on the MXU ---
        # L is small (default 5) so a full Python unroll of the step loop is fine.
        for k in range(1, L - 1):
            xk = x_ref[pl.ds(k * D, D), cols].astype(jnp.float32)      # (D, C)
            g = jnp.concatenate(
                [xk[j:j + 1, :] * h for j in range(D)], axis=0)        # (D*R, C)
            h = jnp.dot(w2[k - 1], g,
                        preferred_element_type=jnp.float32)            # (R, C)

        # --- last step: omega folded -> (D, R) @ (R, C) matmul + small sublane reduce ---
        xl = x_ref[pl.ds((L - 1) * D, D), cols].astype(jnp.float32)    # (D, C)
        t = jnp.dot(wlast, h, preferred_element_type=jnp.float32)      # (D, C)
        out_ref[pl.ds(0, 1), cols] = jnp.sum(xl * t, axis=0, keepdims=True)  # (1, C)
        return carry

    lax.fori_loop(0, n_chunks, chunk_body, 0, unroll=True)


# ----------------------------------------------------------------------------
# Weight preparation: run ONCE per parameter update, not per forward call.
# ----------------------------------------------------------------------------
def prepare_weights(alpha, cores, omega):
    """alpha (1,R), cores (L,R,D,R), omega (R,1) -> (w0 (R,D), w2 (L-2,R,D*R), wlast (D,R))."""
    L, R, D, _ = cores.shape
    alpha = alpha.astype(jnp.float32)
    cores = cores.astype(jnp.float32)
    omega = omega.astype(jnp.float32)
    # W0[s, j]          = sum_r alpha[r] * cores[0][r, j, s]
    w0 = jnp.einsum('r,rjs->sj', alpha[0], cores[0])
    # Wlast[j, r]       = sum_s cores[L-1][r, j, s] * omega[s]
    wlast = jnp.einsum('rjs,s->jr', cores[L - 1], omega[:, 0])
    # W2[k-1][s, j*R+r] = cores[k][r, j, s]
    if L > 2:
        w2 = jnp.transpose(cores[1:L - 1], (0, 3, 2, 1)).reshape(L - 2, R, D * R)
    else:
        w2 = jnp.zeros((1, R, D * R), jnp.float32)   # never read when L == 2
    return w0, w2, wlast


def prepare_inputs(x, dtype=jnp.float32):
    """(N, L, D) -> flattened lane-dense (L*D, N).  One-time layout change; keep it off the
    hot path.  Use dtype=jnp.bfloat16 on HBM-bound v5e/v6e (kernel upcasts to f32)."""
    N, L, D = x.shape
    return jnp.transpose(x.astype(dtype), (1, 2, 0)).reshape(L * D, N)


# ----------------------------------------------------------------------------
# Hot-path forward: x already in (L*D, N), weights already prepared.
# ----------------------------------------------------------------------------
def hankel_forward(x_ldn, w0, w2, wlast, *, batch_tile=None, chunk=None):
    LD, N = x_ldn.shape
    R, D = w0.shape
    assert LD % D == 0
    L = LD // D
    assert L >= 2, "kernel assumes at least two TT cores"
    Lm = w2.shape[0]

    # ---- grid-step size: big (amortize ~0.35us/step), but keep >=2 steps when the batch
    #      allows it (v7x shards the 'parallel' batch axis across its 2 TensorCores) ----
    if batch_tile is None:
        half = _round_up(pl.cdiv(N, 2), 128)
        batch_tile = max(128, min(8192, half))
        if batch_tile >= 512:
            batch_tile = _round_up(batch_tile, 512)
    assert batch_tile % 128 == 0, "batch_tile must be a multiple of 128 lanes"
    TN = batch_tile

    # ---- in-kernel strip-mine sub-chunk (bounds vreg live ranges inside a big step) ----
    if chunk is None:
        chunk = 512 if TN % 512 == 0 else (256 if TN % 256 == 0 else 128)
    assert TN % chunk == 0 and chunk % 128 == 0

    grid = (pl.cdiv(N, TN),)   # partial last block; no pad of x, OOB lanes are discarded

    kernel = functools.partial(_hankel_kernel, length=L, input_dim=D, rank=R, chunk=chunk)

    out = pl.pallas_call(
        kernel,
        out_shape=jax.ShapeDtypeStruct((1, N), jnp.float32),
        grid_spec=pltpu.PrefetchScalarGridSpec(
            num_scalar_prefetch=0,
            grid=grid,
            in_specs=[
                pl.BlockSpec((LD, TN), lambda i: (0, i)),            # x tile (lane-dense)
                # constant-index inputs -> held resident across grid steps
                pl.BlockSpec((R, D), lambda i: (0, 0)),              # W0  (alpha folded)
                pl.BlockSpec((Lm, R, D * R), lambda i: (0, 0, 0)),   # middle cores (W2 form)
                pl.BlockSpec((D, R), lambda i: (0, 0)),              # Wlast (omega folded)
            ],
            out_specs=pl.BlockSpec((1, TN), lambda i: (0, i)),       # lane-dense output
        ),
        compiler_params=pltpu.CompilerParams(
            dimension_semantics=("parallel",)),
    )(x_ldn, w0, w2, wlast)

    return out[0]


def hankel_forward_nld(x, alpha, cores, omega, **kw):
    """Drop-in equivalent of SGD_Hankel_v2.forward for x of shape (N, L, D).
    (Prefer prepare_weights/prepare_inputs + hankel_forward to keep prep off the hot path.)"""
    w0, w2, wlast = prepare_weights(alpha, cores, omega)
    return hankel_forward(prepare_inputs(x), w0, w2, wlast, **kw)


# ----------------------------------------------------------------------------
# Deterministic parameter init matching SGD_Hankel_v2.__init__ (shapes + xavier std +
# padding identity slice); values come from the jax PRNG, not torch's.
# ----------------------------------------------------------------------------
def init_params(key, *, length, rank, input_dim, padding=True):
    if not padding:
        input_dim -= 1
    k_alpha, k_cores, k_omega = jax.random.split(key, 3)

    std_alpha = math.sqrt(2.0 / (1 + rank))                        # (1, R)
    alpha = std_alpha * jax.random.normal(k_alpha, (1, rank), jnp.float32)

    std_core = math.sqrt(2.0 / (input_dim * rank + rank * rank))   # (R, D, R)
    cores = std_core * jax.random.normal(
        k_cores, (length, rank, input_dim, rank), jnp.float32)
    if padding:
        eye = jnp.eye(rank, dtype=jnp.float32)
        cores = cores.at[:, :, -1, :].set(eye)                     # core[:, -1, :] = I

    std_omega = math.sqrt(2.0 / (rank + 1))                        # (R, 1)
    omega = std_omega * jax.random.normal(k_omega, (rank, 1), jnp.float32)
    return alpha, cores, omega, input_dim


# pure-JAX reference (mirrors traver_tt einsums) for correctness check
def ref_forward(x, alpha, cores, omega):
    merged = jnp.einsum('ij,jkl->ikl', alpha, cores[0])
    merged = jnp.einsum('ijk,nj->nik', merged, x[:, 0, :])
    for k in range(1, cores.shape[0]):
        merged = jnp.einsum('nik,kjl,nj->nil', merged, cores[k], x[:, k, :])
    return jnp.einsum('nil,lk->nik', merged, omega)[:, 0, 0]


if __name__ == "__main__":
    LENGTH, RANK, INPUT_DIM = 5, 8, 4

    key = jax.random.PRNGKey(0)
    k_param, k_x1, k_x2 = jax.random.split(key, 3)

    alpha, cores, omega, D = init_params(
        k_param, length=LENGTH, rank=RANK, input_dim=INPUT_DIM, padding=True)

    # Weight folding hoisted out of the per-call hot path (redo after each param update).
    w0, w2, wlast = prepare_weights(alpha, cores, omega)

    # Case 1: batch not a multiple of the tile -> partial last grid block (no pad anywhere).
    x1 = jax.random.normal(k_x1, (200, LENGTH, D), jnp.float32)
    out1 = jax.block_until_ready(hankel_forward(prepare_inputs(x1), w0, w2, wlast))
    exp1 = jax.block_until_ready(ref_forward(x1, alpha, cores, omega))
    np.testing.assert_allclose(np.asarray(out1), np.asarray(exp1), rtol=1e-4, atol=1e-5)

    # Case 2: exercises in-kernel strip-mining (n_chunks > 1) plus a partial last block.
    x2 = jax.random.normal(k_x2, (1500, LENGTH, D), jnp.float32)
    out2 = jax.block_until_ready(
        hankel_forward(prepare_inputs(x2), w0, w2, wlast, batch_tile=1024, chunk=512))
    exp2 = jax.block_until_ready(ref_forward(x2, alpha, cores, omega))
    np.testing.assert_allclose(np.asarray(out2), np.asarray(exp2), rtol=1e-4, atol=1e-5)

    # Drop-in API matching SGD_Hankel_v2.forward(x) with x of shape (N, L, D).
    out3 = jax.block_until_ready(hankel_forward_nld(x1, alpha, cores, omega))
    np.testing.assert_allclose(np.asarray(out3), np.asarray(out1), rtol=1e-6, atol=1e-7)

    # TODO(synk): loss_func / get_2norm / learning / normalize are training-time, host-side
    # utilities, not part of forward(); only the forward hot path is implemented in Pallas.
    print("KERNEL_OK")
</pallas_src>

<mosaic_0001>
module attributes {stable_mosaic.version = 11 : i64} {
  func.func @_hankel_kernel(%arg0: i32, %arg1: memref<20x128xf32, #tpu.memory_space<vmem>>, %arg2: memref<8x4xf32, #tpu.memory_space<vmem>>, %arg3: memref<3x8x32xf32, #tpu.memory_space<vmem>>, %arg4: memref<4x8xf32, #tpu.memory_space<vmem>>, %arg5: memref<1x128xf32, #tpu.memory_space<vmem>>) attributes {dimension_semantics = [#tpu.dimension_semantics<parallel>], iteration_bounds = array<i64: 2>, scalar_prefetch = 0 : i64, scratch_operands = 0 : i64, tpu.core_type = #tpu.core_type<tc>, window_params = [{transform_indices = @transform_0, window_bounds = array<i64: 20, 128>}, {pipeline_mode = #tpu.pipeline_mode<synchronous>, transform_indices = @transform_1, window_bounds = array<i64: 8, 4>}, {pipeline_mode = #tpu.pipeline_mode<synchronous>, transform_indices = @transform_2, window_bounds = array<i64: 3, 8, 32>}, {pipeline_mode = #tpu.pipeline_mode<synchronous>, transform_indices = @transform_3, window_bounds = array<i64: 4, 8>}, {transform_indices = @transform_4, window_bounds = array<i64: 1, 128>}]} {
    %c0 = arith.constant 0 : index
    %c0_0 = arith.constant 0 : index
    %0 = vector.load %arg2[%c0, %c0_0] : memref<8x4xf32, #tpu.memory_space<vmem>>, vector<8x4xf32>
    %c0_1 = arith.constant 0 : index
    %c0_2 = arith.constant 0 : index
    %1 = vector.load %arg4[%c0_1, %c0_2] : memref<4x8xf32, #tpu.memory_space<vmem>>, vector<4x8xf32>
    %c0_3 = arith.constant 0 : index
    %c0_4 = arith.constant 0 : index
    %c0_5 = arith.constant 0 : index
    %2 = vector.load %arg3[%c0_3, %c0_4, %c0_5] : memref<3x8x32xf32, #tpu.memory_space<vmem>>, vector<3x8x32xf32>
    %c0_i32 = arith.constant 0 : i32
    %c128_i32 = arith.constant 128 : i32
    %3 = arith.muli %c0_i32, %c128_i32 : i32
    %4 = tpu.assume_multiple %3, 128 : i32
    %c0_6 = arith.constant 0 : index
    %5 = arith.index_cast %4 : i32 to index
    %6 = vector.load %arg1[%c0_6, %5] : memref<20x128xf32, #tpu.memory_space<vmem>>, vector<4x128xf32>
    %cst = arith.constant dense<0.000000e+00> : vector<8x128xf32>
    %7 = tpu.matmul %0, %6, %cst {dimension_numbers = #tpu.dot_dimension_numbers<[1], [0], [0], [1], [0, 0, 1, 1], [], []>} : vector<8x4xf32>, vector<4x128xf32>, vector<8x128xf32> -> vector<8x128xf32>
    %c4 = arith.constant 4 : index
    %8 = arith.index_cast %4 : i32 to index
    %9 = vector.load %arg1[%c4, %8] : memref<20x128xf32, #tpu.memory_space<vmem>>, vector<4x128xf32>
    %10 = vector.extract_strided_slice %9 {offsets = [0, 0], sizes = [1, 128], strides = [1, 1]} : vector<4x128xf32> to vector<1x128xf32>
    %11 = vector.broadcast %10 : vector<1x128xf32> to vector<8x128xf32>
    %12 = arith.mulf %11, %7 : vector<8x128xf32>
    %13 = vector.extract_strided_slice %9 {offsets = [1, 0], sizes = [1, 128], strides = [1, 1]} : vector<4x128xf32> to vector<1x128xf32>
    %14 = vector.broadcast %13 : vector<1x128xf32> to vector<8x128xf32>
    %15 = arith.mulf %14, %7 : vector<8x128xf32>
    %16 = vector.extract_strided_slice %9 {offsets = [2, 0], sizes = [1, 128], strides = [1, 1]} : vector<4x128xf32> to vector<1x128xf32>
    %17 = vector.broadcast %16 : vector<1x128xf32> to vector<8x128xf32>
    %18 = arith.mulf %17, %7 : vector<8x128xf32>
    %19 = vector.extract_strided_slice %9 {offsets = [3, 0], sizes = [1, 128], strides = [1, 1]} : vector<4x128xf32> to vector<1x128xf32>
    %20 = vector.broadcast %19 : vector<1x128xf32> to vector<8x128xf32>
    %21 = arith.mulf %20, %7 : vector<8x128xf32>
    %22 = tpu.concatenate %12, %15, %18, %21 in 0 : vector<8x128xf32>, vector<8x128xf32>, vector<8x128xf32>, vector<8x128xf32> -> vector<32x128xf32>
    %23 = vector.extract_strided_slice %2 {offsets = [0, 0, 0], sizes = [1, 8, 32], strides = [1, 1, 1]} : vector<3x8x32xf32> to vector<1x8x32xf32>
    %24 = vector.shape_cast %23 : vector<1x8x32xf32> to vector<8x32xf32>
    %cst_7 = arith.constant dense<0.000000e+00> : vector<8x128xf32>
    %25 = tpu.matmul %24, %22, %cst_7 {dimension_numbers = #tpu.dot_dimension_numbers<[1], [0], [0], [1], [0, 0, 1, 1], [], []>} : vector<8x32xf32>, vector<32x128xf32>, vector<8x128xf32> -> vector<8x128xf32>
    %c8 = arith.constant 8 : index
    %26 = arith.index_cast %4 : i32 to index
    %27 = vector.load %arg1[%c8, %26] : memref<20x128xf32, #tpu.memory_space<vmem>>, vector<4x128xf32>
    %28 = vector.extract_strided_slice %27 {offsets = [0, 0], sizes = [1, 128], strides = [1, 1]} : vector<4x128xf32> to vector<1x128xf32>
    %29 = vector.broadcast %28 : vector<1x128xf32> to vector<8x128xf32>
    %30 = arith.mulf %29, %25 : vector<8x128xf32>
    %31 = vector.extract_strided_slice %27 {offsets = [1, 0], sizes = [1, 128], strides = [1, 1]} : vector<4x128xf32> to vector<1x128xf32>
    %32 = vector.broadcast %31 : vector<1x128xf32> to vector<8x128xf32>
    %33 = arith.mulf %32, %25 : vector<8x128xf32>
    %34 = vector.extract_strided_slice %27 {offsets = [2, 0], sizes = [1, 128], strides = [1, 1]} : vector<4x128xf32> to vector<1x128xf32>
    %35 = vector.broadcast %34 : vector<1x128xf32> to vector<8x128xf32>
    %36 = arith.mulf %35, %25 : vector<8x128xf32>
    %37 = vector.extract_strided_slice %27 {offsets = [3, 0], sizes = [1, 128], strides = [1, 1]} : vector<4x128xf32> to vector<1x128xf32>
    %38 = vector.broadcast %37 : vector<1x128xf32> to vector<8x128xf32>
    %39 = arith.mulf %38, %25 : vector<8x128xf32>
    %40 = tpu.concatenate %30, %33, %36, %39 in 0 : vector<8x128xf32>, vector<8x128xf32>, vector<8x128xf32>, vector<8x128xf32> -> vector<32x128xf32>
    %41 = vector.extract_strided_slice %2 {offsets = [1, 0, 0], sizes = [1, 8, 32], strides = [1, 1, 1]} : vector<3x8x32xf32> to vector<1x8x32xf32>
    %42 = vector.shape_cast %41 : vector<1x8x32xf32> to vector<8x32xf32>
    %cst_8 = arith.constant dense<0.000000e+00> : vector<8x128xf32>
    %43 = tpu.matmul %42, %40, %cst_8 {dimension_numbers = #tpu.dot_dimension_numbers<[1], [0], [0], [1], [0, 0, 1, 1], [], []>} : vector<8x32xf32>, vector<32x128xf32>, vector<8x128xf32> -> vector<8x128xf32>
    %c12 = arith.constant 12 : index
    %44 = arith.index_cast %4 : i32 to index
    %45 = vector.load %arg1[%c12, %44] : memref<20x128xf32, #tpu.memory_space<vmem>>, vector<4x128xf32>
    %46 = vector.extract_strided_slice %45 {offsets = [0, 0], sizes = [1, 128], strides = [1, 1]} : vector<4x128xf32> to vector<1x128xf32>
    %47 = vector.broadcast %46 : vector<1x128xf32> to vector<8x128xf32>
    %48 = arith.mulf %47, %43 : vector<8x128xf32>
    %49 = vector.extract_strided_slice %45 {offsets = [1, 0], sizes = [1, 128], strides = [1, 1]} : vector<4x128xf32> to vector<1x128xf32>
    %50 = vector.broadcast %49 : vector<1x128xf32> to vector<8x128xf32>
    %51 = arith.mulf %50, %43 : vector<8x128xf32>
    %52 = vector.extract_strided_slice %45 {offsets = [2, 0], sizes = [1, 128], strides = [1, 1]} : vector<4x128xf32> to vector<1x128xf32>
    %53 = vector.broadcast %52 : vector<1x128xf32> to vector<8x128xf32>
    %54 = arith.mulf %53, %43 : vector<8x128xf32>
    %55 = vector.extract_strided_slice %45 {offsets = [3, 0], sizes = [1, 128], strides = [1, 1]} : vector<4x128xf32> to vector<1x128xf32>
    %56 = vector.broadcast %55 : vector<1x128xf32> to vector<8x128xf32>
    %57 = arith.mulf %56, %43 : vector<8x128xf32>
    %58 = tpu.concatenate %48, %51, %54, %57 in 0 : vector<8x128xf32>, vector<8x128xf32>, vector<8x128xf32>, vector<8x128xf32> -> vector<32x128xf32>
    %59 = vector.extract_strided_slice %2 {offsets = [2, 0, 0], sizes = [1, 8, 32], strides = [1, 1, 1]} : vector<3x8x32xf32> to vector<1x8x32xf32>
    %60 = vector.shape_cast %59 : vector<1x8x32xf32> to vector<8x32xf32>
    %cst_9 = arith.constant dense<0.000000e+00> : vector<8x128xf32>
    %61 = tpu.matmul %60, %58, %cst_9 {dimension_numbers = #tpu.dot_dimension_numbers<[1], [0], [0], [1], [0, 0, 1, 1], [], []>} : vector<8x32xf32>, vector<32x128xf32>, vector<8x128xf32> -> vector<8x128xf32>
    %c16 = arith.constant 16 : index
    %62 = arith.index_cast %4 : i32 to index
    %63 = vector.load %arg1[%c16, %62] : memref<20x128xf32, #tpu.memory_space<vmem>>, vector<4x128xf32>
    %cst_10 = arith.constant dense<0.000000e+00> : vector<4x128xf32>
    %64 = tpu.matmul %1, %61, %cst_10 {dimension_numbers = #tpu.dot_dimension_numbers<[1], [0], [0], [1], [0, 0, 1, 1], [], []>} : vector<4x8xf32>, vector<8x128xf32>, vector<4x128xf32> -> vector<4x128xf32>
    %65 = arith.mulf %63, %64 : vector<4x128xf32>
    %cst_11 = arith.constant dense<0.000000e+00> : vector<128xf32>
    %66 = vector.multi_reduction <add>, %65, %cst_11 [0] : vector<4x128xf32> to vector<128xf32>
    %67 = vector.shape_cast %66 : vector<128xf32> to vector<1x128xf32>
    %c0_12 = arith.constant 0 : index
    %68 = arith.index_cast %4 : i32 to index
    %69 = vector.load %arg5[%c0_12, %68] : memref<1x128xf32, #tpu.memory_space<vmem>>, vector<1x128xf32>
    tpu.vector_store %arg5[%c0_12, %68], %67 {strides = array<i32>} : memref<1x128xf32, #tpu.memory_space<vmem>>, vector<1x128xf32>,
    %c1_i32 = arith.constant 1 : i32
    return
  }
  func.func @transform_0(%arg0: i32) -> (i32, i32) {
    %c0_i32 = arith.constant 0 : i32
    %c0_i32_0 = arith.constant 0 : i32
    return %c0_i32, %arg0 : i32, i32
  }
  func.func @transform_1(%arg0: i32) -> (i32, i32) {
    %c0_i32 = arith.constant 0 : i32
    %c0_i32_0 = arith.constant 0 : i32
    %c0_i32_1 = arith.constant 0 : i32
    return %c0_i32, %c0_i32_0 : i32, i32
  }
  func.func @transform_2(%arg0: i32) -> (i32, i32, i32) {
    %c0_i32 = arith.constant 0 : i32
    %c0_i32_0 = arith.constant 0 : i32
    %c0_i32_1 = arith.constant 0 : i32
    %c0_i32_2 = arith.constant 0 : i32
    return %c0_i32, %c0_i32_0, %c0_i32_1 : i32, i32, i32
  }
  func.func @transform_3(%arg0: i32) -> (i32, i32) {
    %c0_i32 = arith.constant 0 : i32
    %c0_i32_0 = arith.constant 0 : i32
    %c0_i32_1 = arith.constant 0 : i32
    return %c0_i32, %c0_i32_0 : i32, i32
  }
  func.func @transform_4(%arg0: i32) -> (i32, i32) {
    %c0_i32 = arith.constant 0 : i32
    %c0_i32_0 = arith.constant 0 : i32
    return %c0_i32, %arg0 : i32, i32
  }
}

</mosaic_0001>

<bundles_post_ra>
// kernel: tpu_custom_call.1
= control target key start
LH: loop header
LB: loop body
LE: loop exit
PB: predicated region body
PF: predicated region fallthrough
CT: control target
= control target key end

     0   :  { %9 = vsyncpa [#allocation3], 0  ;;  %s1285_s0 = inlined_call_operand.hbm [shape: f32[20,200], index: 0, kind: input, shape index: {}]   ;;  %s1286_s1 = inlined_call_operand.vmem [shape: f32[8,4], index: 1, kind: input, shape index: {}]   ;;  %s1287_s2 = inlined_call_operand.hbm [shape: f32[3,8,32], index: 2, kind: input, shape index: {}]   ;;  %s1288_s3 = inlined_call_operand.vmem [shape: f32[4,8], index: 3, kind: input, shape index: {}]   ;;  %s1289_s4 = inlined_call_operand.hbm [shape: f32[1,200], index: 4, kind: output, shape index: {}]  }
   0x1   :  { %11 = vsyncpa [#allocation3 + $0x1], 0 }
   0x2   :  { %12 = vsyncpa [#allocation6], 0 }
   0x3   :  { %13 = vsyncpa [#allocation4], 0 }
   0x4   :  { %15 = vsyncpa [#allocation4 + $0x1], 0  ;;  %s1068_s15 = smov 0   ;;  %s1070_s16 = smov 0  }
   0x5   :  { %s1072_s17 = smov 0   ;;  %s1074_s18 = smov 0  }
   0x6 LB: > { %s1089_s19 = sadd.s32 4294967295, %s1033_s18   ;;  %s769_s20 = sadd.s32 4294967294, %s1033_s18   ;;  %s1033_s18 = sphi %s1074_s18, %s1311_s18   ;;  %s1029_s17 = sphi %s1072_s17, %s1310_s17   ;;  %s1025_s16 = sphi %s1070_s16, %s1309_s16   ;;  %s1021_s15 = sphi %s1068_s15, %s1308_s15  }
   0x7   : > { %s1093_s21 = sadd.s32 1, %s1033_s18   ;;  %s28_s22 = sadd.s32 1, %s1029_s17 }
   0x8   : > { %s25_s23 = ssub.s32 %s1033_s18, %s1093_s21  ;;  %p35_p0 = scmp.ne.s32.totalorder %s1029_s17, %s1025_s16 }
   0x9   : > { %p26_p1 = scmp.eq.s32.totalorder %s25_s23, 0  ;;  %p36_p2 = scmp.eq.s32.totalorder %s1033_s18, 0 }
   0xa   : > { %p41_p3 = scmp.ne.s32.totalorder %s1025_s16, %s1021_s15  ;;  %p1293_p4 = scmp.eq.s32.totalorder %s1089_s19, 0 }
   0xb   : > { %s1105_s24 = scalar_select %p26_p1, %s1029_s17, %s28_s22  }
   0xc   : > { %p1107_p5 = por %p36_p2, %p35_p0  ;;  %p1113_p6 = por %p1293_p4, %p41_p3 }
   0xd   : > { %p128_p7 = scmp.eq.s32.totalorder %s1089_s19, 1  ;;  %p134_p8 = scmp.eq.s32.totalorder %s769_s20, 1 }
   0xe   : > { %s1295_s26 = scalar_select %p1113_p6, 1, 0 }
   0xf   : > { %p770_p9 = scmp.ge.s32.totalorder %s1033_s18, 1  ;;  %p141_p10 = scmp.lt.s32.totalorder %s1033_s18, 3 }
  0x10   : > { %p1120_p11 = por %p128_p7, %p35_p0  ;;  %p1124_p12 = por %p134_p8, %p41_p3 }
  0x11   : > { %p1128_p13 = pnand %p770_p9, %p141_p10  ;;  %s1035_s30 = smov [#allocation5]  }
  0x12   : > { %s1296_s27 = scalar_select %p1120_p11, 1, 0 }
  0x13   : > { %s1297_s28 = scalar_select %p1124_p12, 1, 0 }
  0x14   : > { %s1298_s29 = scalar_select %p1128_p13, 1, 0 }
  0x15   : > { %p857_p1 = pneg %p1128_p13  ;;  %s156_s5 = sshll.u32 %s1035_s30, 4  ;;  %s157_s5 = int_to_ptr.vmem [resolvable:$true] %s156_s5 }
  0x16   : > { %p870_p3 = scmp.lt.s32.totalorder %s1033_s18, 2  ;;  %s173_s7 = sand.u32 1, %s1029_s17  }
  0x17   : > { %p1136_p2 = pnand %p857_p1, %p1293_p4  ;;  %s922_s8 = scalar_lea.vmem %s157_s5, 384 }
  0x18   : > { %p923_p8 = scmp.ne.s32.totalorder %s157_s5, %s922_s8  ;;  %p930_p12 = scmp.lt.s32.totalorder %s157_s5, %s157_s5 }
  0x19   : > { %p913_p7 = pneg %p1136_p2  ;;  %p931_p11 = scmp.lt.s32.totalorder %s922_s8, %s922_s8 }
  0x1b   : > { %p925_p9 = pnand %p923_p8, %p913_p7  ;;  %p932_p6 = por %p931_p11, %p930_p12 }
  0x1d   : > { %p926_p10 = pneg %p925_p9 }
  0x1f   : > { %p933_p13 = pnand %p932_p6, %p926_p10 }
  0x21   : > { %936 = shalt.err (!%p933_p13)
}
  0x22   : > { %s1036_s9 = smov 128   ;;  %s1037_s10 = smov 8  }
  0x23   : > { %860 = dma.hbm_to_vmem [thread:$0]  (!%p1136_p2), %s1287_s2, 384, %s157_s5, [#allocation6], %s1036_s9, %s1036_s9, %s1037_s10  }
  0x24   : > { %p1157_p1 = pnand %p870_p3, %p1107_p5  ;;  %s847_s14 = smul.u32 24, %s173_s7 }
  0x25   : > { %s773_s20 = sshll.u32 %s1033_s18, 7  ;;  %s1169_s25 = scalar_lea.sflag [#allocation3], %s173_s7 }
  0x26   : > { %s1165_s30 = scalar_lea.hbm %s1285_s0, %s773_s20  ;;  %s177_s6 = scalar_lea.vmem [#allocation2], %s847_s14 }
  0x27   : > { %s183_s8 = sshll.u32 %s177_s6, 4  ;;  %s937_s5 = scalar_lea.hbm %s1165_s30, 384  ;;  %s1167_s8 = int_to_ptr.vmem [resolvable:$true] %s183_s8 }
  0x28   : > { %p938_p5 = scmp.ne.s32.totalorder %s1165_s30, %s937_s5  ;;  %p939_p6 = pneg %p1157_p1 }
  0x29   : > { %s942_s20 = scalar_lea.hbm %s1285_s0, 768  ;;  %p943_p13 = scmp.lt.s32.totalorder %s1165_s30, %s1285_s0 }
  0x2a   : > { %p940_p11 = pnand %p939_p6, %p938_p5  ;;  %p944_p2 = scmp.lt.s32.totalorder %s942_s20, %s937_s5 }
  0x2c   : > { %p941_p12 = pneg %p940_p11  ;;  %p945_p3 = por %p944_p2, %p943_p13 }
  0x2e   : > { %p946_p7 = pnand %p945_p3, %p941_p12 }
  0x30   : > { %949 = shalt.err (!%p946_p7)
}
  0x31   : > { %s950_s7 = scalar_lea.vmem %s1167_s8, 384  ;;  %s1038_s14 = smov [#allocation2]  }
  0x32   : > { %p951_p8 = scmp.ne.s32.totalorder %s1167_s8, %s950_s7  ;;  %s955_s6 = sshll.u32 %s1038_s14, 4  ;;  %s956_s6 = int_to_ptr.vmem [resolvable:$false] %s955_s6 }
  0x33   : > { %s957_s11 = scalar_lea.vmem %s956_s6, 768  ;;  %p958_p5 = scmp.lt.s32.totalorder %s1167_s8, %s956_s6 }
  0x34   : > { %p953_p9 = pnand %p951_p8, %p939_p6  ;;  %p959_p11 = scmp.lt.s32.totalorder %s957_s11, %s950_s7 }
  0x36   : > { %p954_p10 = pneg %p953_p9  ;;  %p960_p0 = por %p959_p11, %p958_p5 }
  0x38   : > { %p961_p4 = pnand %p960_p0, %p954_p10 }
  0x3a   : > { %964 = shalt.err (!%p961_p4)
}
  0x3b   : > { %s1039_s5 = smov 256   ;;  %p1301_p6 = scmp.ne.s32.totalorder %s1298_s29, 0 }
  0x3c   : > { %864 = dma.hbm_to_vmem [thread:$0]  (!%p1157_p1), %s1165_s30, 384, %s1167_s8, %s1169_s25, %s1039_s5, %s1036_s9, %s1037_s10  }
  0x3d   : > { %195 = sbr.rel (%p1301_p6) target bundleno = 1095 (0x447), region = 36  ;;  %s1195_s12 = sand.u32 (!%p1301_p6), 1, %s1025_s16  }
  0x3e   : > { %s848_s20 = smul.u32 (!%p1301_p6), 24, %s1195_s12  ;;  %s198_s22 = scalar_lea.sflag (!%p1301_p6), [#allocation3], %s1195_s12 }
  0x3f   : > { %p1302_p4 = scmp.ne.s32.totalorder (!%p1301_p6), %s1295_s26, 0 }
  0x40   : > { %s1199_s23 = scalar_lea.vmem (!%p1301_p6), [#allocation2], %s848_s20 }
  0x42   : > { %1008 = dma.done.wait (%p1302_p4), %s198_s22, 384  }
  0x43   : > { %1010 = vsyncadd (%p1302_p4), %s198_s22, 4294966912  ;;  %p1303_p0 = scmp.eq.s32.totalorder %s1089_s19, 0 }
  0x45   : > { %1012 = dma.done.wait (%p1303_p0), [#allocation6], 384   ;;  %p1304_p1 = pmov %p1303_p0 }
  0x46   : > { %v1040_v0 = vmov 0.0   ;;  %vm1041_vm0 = vmmov 0   ;;  %vm239_vm1 = vcmask 1043456   ;;  %vm235_vm2 = vcmask 31744   ;;  %v234_v1 = vld [vmem:[%s1199_s23] sm:$0xf] }
  0x47   : > { %1014 = vsyncadd (%p1304_p1), [#allocation6], 4294966912  ;;  %804 = vmatprep.subr.mxu0 %v1040_v0  ;;  %806 = vmatprep.mubr.msk.f32.mxu0 %vm1041_vm0, %v1040_v0  ;;  %v229_v2 = vld [vmem:[%s1286_s1] sm:$0xff]  ;;  %v314_v3 = vlaneseq  ;;  %v231_v20 = vld [vmem:[#allocation5] sm:$0xff]  ;;  %vm334_vm3 = vcmask 261120   ;;  %vm597_vm4 = vcmask 64512  }
  0x48   : > { %809 = vmatprep.subr.mxu1 %v1040_v0  ;;  %817 = vmatprep.mubr.msk.f32.mxu1 %vm1041_vm0, %v1040_v0  ;;  %v313_v6 = vld [vmem:[%s1199_s23 + $0x4] sm:$0xf]  ;;  %v408_v21 = vld [vmem:[%s1199_s23 + $0x8] sm:$0xf]  ;;  %v502_v33 = vld [vmem:[%s1199_s23 + $0xc] sm:$0xf] }
  0x49   : > { %805 = vmatpush3.msk.msra.mxu0 %vm239_vm1, %v234_v1  ;;  %v315_v4 = vshrl.u32 %v314_v3, 7  ;;  %v232_v32 = vld [vmem:[#allocation5 + $0x8] sm:$0xff]  ;;  %v233_v44 = vld [vmem:[#allocation5 + $0x10] sm:$0xff]  ;;  %v596_v48 = vld [vmem:[%s1199_s23 + $0x10] sm:$0xf]  ;;  %s782_s13 = sshll.u32 %s1089_s19, 4 }
  0x4a   : > { %807 = vmatmul.mubr.msk.f32.vlgmr.msra.gmra.mxu0 %vm235_vm2, %v229_v2  ;;  %820 = vmatprep.subr.mxu0 %v1040_v0  ;;  %v230_v45 = vld [vmem:[%s1288_s3] sm:$0xf]  ;;  %s228_s30 = scalar_lea.vmem [#allocation7], %s1195_s12  ;;  %s691_s14 = scalar_lea.hbm %s1289_s4, %s782_s13 }
  0x4b   : > { %828 = vmatprep.mubr.msk.f32.mxu0 %vm1041_vm0, %v1040_v0  ;;  %v331_v5 = vsub.s32 3, %v315_v4  ;;  %v326_v7 = vsub.s32 2, %v315_v4  ;;  %v321_v9 = vsub.s32 1, %v315_v4  ;;  %v316_v11 = vsub.s32 0, %v315_v4  ;;  %s693_s8 = sshll.u32 %s228_s30, 4  ;;  %s681_s6 = scalar_lea.sflag [#allocation4], %s1195_s12  ;;  %s694_s8 = int_to_ptr.vmem [resolvable:$true] %s693_s8 }
  0x4c   : > { %s965_s11 = scalar_lea.vmem %s694_s8, 16  ;;  %p1305_p13 = scmp.ne.s32.totalorder %s1296_s27, 0 }
  0x4d   : > { %v332_v8 = vrot.slane %v313_v6, %v331_v5  ;;  %v327_v10 = vrot.slane %v313_v6, %v326_v7  ;;  %v322_v14 = vrot.slane %v313_v6, %v321_v9  ;;  %v317_v17 = vrot.slane %v313_v6, %v316_v11  ;;  %p966_p12 = scmp.ne.s32.totalorder %s694_s8, %s965_s11  ;;  %s1042_s5 = smov [#allocation7]  }
  0x4e   : > { %v427_v22 = vrot.slane %v408_v21, %v331_v5  ;;  %v422_v23 = vrot.slane %v408_v21, %v326_v7  ;;  %v417_v25 = vrot.slane %v408_v21, %v321_v9  ;;  %v412_v28 = vrot.slane %v408_v21, %v316_v11  ;;  %s969_s20 = sshll.u32 %s1042_s5, 4  ;;  %s970_s20 = int_to_ptr.vmem [resolvable:$false] %s969_s20 }
  0x4f   : > { %v521_v34 = vrot.slane %v502_v33, %v331_v5  ;;  %v516_v35 = vrot.slane %v502_v33, %v326_v7  ;;  %v511_v37 = vrot.slane %v502_v33, %v321_v9  ;;  %v506_v40 = vrot.slane %v502_v33, %v316_v11  ;;  %p967_p2 = pnand %p966_p12, %p1305_p13  ;;  %s971_s19 = scalar_lea.vmem %s970_s20, 32 }
  0x50   : > { %p972_p7 = scmp.lt.s32.totalorder %s694_s8, %s970_s20  ;;  %p973_p8 = scmp.lt.s32.totalorder %s971_s19, %s965_s11 }
  0x51   : > { %p968_p3 = pneg %p967_p2 }
  0x52   : > { %p974_p9 = por %p973_p8, %p972_p7 }
  0x54   : > { %p975_p10 = pnand %p974_p9, %p968_p3 }
 0x10a   : > { %v309_v12 = vpop.f32.mrf.mxu0 }
 0x10b   : > { %v333_v13 = vmul.f32 %v332_v8, %v309_v12  ;;  %v328_v16 = vmul.f32 %v327_v10, %v309_v12  ;;  %v323_v18 = vmul.f32 %v322_v14, %v309_v12  ;;  %v318_v19 = vmul.f32 %v317_v17, %v309_v12 }
 0x10c   : > { %v808_v15 = vpop.f32.mrf.mxu0 }
 0x10d   : > { %810 = vmatpush3.msra.mxu1 %v333_v13 }
 0x10e   : > { %811 = vmatprep.subr.mxu1 %v1040_v0 }
 0x10f   : > { %812 = vmatpush3.msra.mxu1 %v328_v16 }
 0x110   : > { %813 = vmatprep.subr.mxu1 %v1040_v0 }
 0x111   : > { %814 = vmatpush3.msra.mxu1 %v323_v18 }
 0x112   : > { %815 = vmatprep.subr.mxu1 %v1040_v0 }
 0x113   : > { %816 = vmatpush3.msra.mxu1 %v318_v19 }
 0x114   : > { %818 = vmatmul.mubr.msk.f32.vlgmr.msra.gmra.mxu1 %vm334_vm3, %v231_v20  ;;  %831 = vmatprep.subr.mxu1 %v1040_v0 }
 0x115   : > { %839 = vmatprep.mubr.msk.f32.mxu1 %vm1041_vm0, %v1040_v0 }
 0x1d4   : > { %v404_v24 = vpop.f32.mrf.mxu1 }
 0x1d5   : > { %v428_v26 = vmul.f32 %v427_v22, %v404_v24  ;;  %v423_v29 = vmul.f32 %v422_v23, %v404_v24  ;;  %v418_v30 = vmul.f32 %v417_v25, %v404_v24  ;;  %v413_v31 = vmul.f32 %v412_v28, %v404_v24 }
 0x1d6   : > { %v819_v27 = vpop.f32.mrf.mxu1 }
 0x1d7   : > { %821 = vmatpush3.msra.mxu0 %v428_v26 }
 0x1d8   : > { %822 = vmatprep.subr.mxu0 %v1040_v0 }
 0x1d9   : > { %823 = vmatpush3.msra.mxu0 %v423_v29 }
 0x1da   : > { %824 = vmatprep.subr.mxu0 %v1040_v0 }
 0x1db   : > { %825 = vmatpush3.msra.mxu0 %v418_v30 }
 0x1dc   : > { %826 = vmatprep.subr.mxu0 %v1040_v0 }
 0x1dd   : > { %827 = vmatpush3.msra.mxu0 %v413_v31 }
 0x1de   : > { %829 = vmatmul.mubr.msk.f32.vlgmr.msra.gmra.mxu0 %vm334_vm3, %v232_v32  ;;  %842 = vmatprep.subr.mxu0 %v1040_v0 }
 0x1df   : > { %844 = vmatprep.mubr.msk.f32.mxu0 %vm1041_vm0, %v1040_v0 }
 0x29e   : > { %v498_v36 = vpop.f32.mrf.mxu0 }
 0x29f   : > { %v522_v38 = vmul.f32 %v521_v34, %v498_v36  ;;  %v517_v41 = vmul.f32 %v516_v35, %v498_v36  ;;  %v512_v42 = vmul.f32 %v511_v37, %v498_v36  ;;  %v507_v43 = vmul.f32 %v506_v40, %v498_v36 }
 0x2a0   : > { %v830_v39 = vpop.f32.mrf.mxu0 }
 0x2a1   : > { %832 = vmatpush3.msra.mxu1 %v522_v38 }
 0x2a2   : > { %833 = vmatprep.subr.mxu1 %v1040_v0 }
 0x2a3   : > { %834 = vmatpush3.msra.mxu1 %v517_v41 }
 0x2a4   : > { %835 = vmatprep.subr.mxu1 %v1040_v0 }
 0x2a5   : > { %836 = vmatpush3.msra.mxu1 %v512_v42 }
 0x2a6   : > { %837 = vmatprep.subr.mxu1 %v1040_v0 }
 0x2a7   : > { %838 = vmatpush3.msra.mxu1 %v507_v43 }
 0x2a8   : > { %840 = vmatmul.mubr.msk.f32.vlgmr.msra.gmra.mxu1 %vm334_vm3, %v233_v44 }
 0x368   : > { %v592_v46 = vpop.f32.mrf.mxu1 }
 0x369   : > { %843 = vmatpush3.msra.mxu0 %v592_v46 }
 0x36a   : > { %v841_v47 = vpop.f32.mrf.mxu1  ;;  %845 = vmatmul.mubr.msk.f32.vlgmr.msra.gmra.mxu0 %vm597_vm4, %v230_v45 }
 0x42a   : > { %v667_v49 = vpop.f32.mrf.mxu0 }
 0x42b   : > { %v671_v50 = vmul.f32 %v667_v49, %v596_v48 }
 0x42c   : > { %v846_v51 = vpop.f32.mrf.mxu0 }
 0x42d   : > { %v672_v52 = vsel %vm239_vm1, %v671_v50, 0.0 }
 0x42e   : > { %v673_v53 = vrot.slane %v672_v52, 4 }
 0x430   : > { %v674_v54 = vadd.f32 %v673_v53, %v672_v52 }
 0x432   : > { %v675_v55 = vrot.slane %v674_v54, 2 }
 0x434   : > { %v676_v56 = vadd.f32 %v675_v55, %v674_v54 }
 0x436   : > { %v677_v57 = vrot.slane %v676_v56, 1 }
 0x438   : > { %v678_v58 = vadd.f32 %v677_v57, %v676_v56 }
 0x43a   : > { %679 = vst [vmem:[%s228_s30] sm:$0x1] %v678_v58 }
 0x43b   : > { %978 = shalt.err (!%p975_p10)
}
 0x43c   : > { %s979_s22 = scalar_lea.hbm %s691_s14, 16  ;;  %s983_s26 = scalar_lea.hbm %s1289_s4, 32 }
 0x43d   : > { %p980_p5 = scmp.ne.s32.totalorder %s691_s14, %s979_s22  ;;  %p984_p4 = scmp.lt.s32.totalorder %s691_s14, %s1289_s4 }
 0x43e   : > { %p985_p0 = scmp.lt.s32.totalorder %s983_s26, %s979_s22 }
 0x43f   : > { %p981_p11 = pnand %p980_p5, %p1305_p13 }
 0x440   : > { %p986_p1 = por %p985_p0, %p984_p4 }
 0x441   : > { %p982_p6 = pneg %p981_p11 }
 0x443   : > { %p987_p12 = pnand %p986_p1, %p982_p6 }
 0x445   : > { %990 = shalt.err (!%p987_p12)
}
 0x446   : > { %855 = dma.vmem_to_hbm [thread:$0]  (%p1305_p13), %s694_s8, 16, %s691_s14, %s681_s6  }
 0x447 PF: > { %s705_s10 = sand.u32 1, %s1021_s15   ;;  %p1306_p2 = scmp.ne.s32.totalorder %s1297_s28, 0 }
 0x448   : > { %p1307_p3 = scmp.ge.s32.totalorder %s1033_s18, 2  ;;  %s706_s13 = scalar_lea.sflag [#allocation4], %s705_s10 }
 0x44a   : > { %p866_p7 = pnand %p1307_p3, %p1306_p2 }
 0x44c   : > { %p867_p8 = pneg %p866_p7 }
 0x44e   : > { %1016 = dma.done.wait (%p867_p8), %s706_s13, 16  }
 0x44f   : > { %1018 = vsyncadd (%p867_p8), %s706_s13, 4294967280  ;;  %p18_p9 = scmp.ge.s32.totalorder %s1093_s21, 4   ;;  %s1308_s15 = smov %s1025_s16 }
 0x450   : > { %s1309_s16 = smov %s1029_s17  ;;  %s1310_s17 = smov %s1105_s24 }
 0x451   : > { %s1311_s18 = smov %s1093_s21  ;;  %20 = sbr.rel (!%p18_p9) target bundleno = 6 (0x6), region = 85 }
 0x456   :  { %710 = vsyncpa [#allocation3], 1 }
 0x457   :  { %712 = vsyncpa [#allocation3 + $0x1], 1 }
 0x458   :  { %713 = vsyncpa [#allocation6], 1 }
 0x459   :  { %714 = vsyncpa [#allocation4], 1 }
 0x45a   :  { %716 = vsyncpa [#allocation4 + $0x1], 1 }

</bundles_post_ra>
